<compile_context>
chip_gen: v7x
topology: tpu7x:2x2x1
jax: 0.10.0
libtpu: 0.0.40
codegen_flags: <defaults>
</compile_context>

<pallas_src>
import functools

import jax
import jax.numpy as jnp
from jax import lax
from jax.experimental import pallas as pl
from jax.experimental.pallas import tpu as pltpu

_MIB = 1024 * 1024


def _focal_weight(w, gamma):
    """(1 - pt)**gamma. Multiply chain for integer gamma (VPU-only, NaN-safe)."""
    g = float(gamma)
    if g == int(g) and 0 <= int(g) <= 16:
        gi = int(g)
        if gi == 0:
            return jnp.ones_like(w)
        out = w
        for _ in range(gi - 1):
            out = out * w
        return out
    # non-integer gamma: clamp so a 1-pt that rounds to -eps cannot NaN
    return jnp.power(jnp.maximum(w, 0.0), jnp.float32(g))


def _focal_ce_kernel(x_ref, t_ref, o_ref, *, gamma, alpha, num_classes,
                     hw, n_tiles, n_inner):
    """One grid step: (C, T) logit slab + (1, T) targets -> per-lane loss sums."""
    s = pl.program_id(1)
    j = pl.program_id(2)
    tile = t_ref.shape[-1]

    @pl.when(j == 0)
    def _init():
        o_ref[...] = jnp.zeros_like(o_ref)

    # With an uneven 2-way split, tail iterations would re-read a clamped block;
    # skip them entirely so nothing is double counted.
    @pl.when(s * n_inner + j < n_tiles)
    def _step():
        x = x_ref[...].astype(jnp.float32)        # (C, T) logits, f32 in-register
        t = t_ref[...].astype(jnp.int32)          # (1, T) class ids (any int dtype)

        # Lanes past the end of the image (boundary block) hold unspecified
        # data; mask them, together with out-of-range labels.
        blk = jnp.minimum(s * n_inner + j, n_tiles - 1)
        lane = lax.broadcasted_iota(jnp.int32, t.shape, 1)            # (1, T)
        valid = (blk * tile + lane < hw) & (t >= 0) & (t < num_classes)

        # log-softmax over the class (sublane) axis; gather fused so the full
        # (C, T) log-prob tensor is never materialised.
        m = jnp.max(x, axis=0, keepdims=True)                         # (1, T)
        z = x - m                                                     # (C, T)
        lse = jnp.log(jnp.sum(jnp.exp(z), axis=0, keepdims=True))     # (1, T)
        cls = lax.broadcasted_iota(jnp.int32, z.shape, 0)             # (C, T)
        z_t = jnp.sum(jnp.where(cls == t, z, 0.0), axis=0, keepdims=True)
        logpt = z_t - lse                                             # (1, T)

        pt = jnp.exp(logpt)
        focus = _focal_weight(1.0 - pt, gamma)
        contrib = alpha * focus * (-logpt)
        o_ref[...] += jnp.where(valid, contrib, 0.0)                  # (1, T) f32


def _tpu_generation():
    try:
        kind = jax.devices()[0].device_kind.lower()
    except Exception:
        return "unknown"
    if "v7" in kind:
        return "v7x"
    if "v6" in kind:
        return "v6e"
    if "v5 lite" in kind or "v5lite" in kind or "v5e" in kind:
        return "v5e"
    return "unknown"


def focal_ce_loss(output, target, *, gamma=2.0, alpha=0.25, tile_px=None):
    """output: (N, C, H, W) float logits (any float dtype), target: (N, H, W) ints."""
    N, C, H, W = output.shape
    HW = H * W
    n_valid = N * HW

    # NCHW-native: (N, C, H*W) is a free view; keep the native logit dtype.
    x = output.reshape(N, C, HW)
    # Keep narrow integer label dtypes (int8/uint8 -> 4x smaller target DMA);
    # only widen unsupported dtypes.
    if target.dtype not in (jnp.int8, jnp.uint8, jnp.int32):
        target = target.astype(jnp.int32)
    t = target.reshape(N, 1, HW)

    # ---- generation-aware VMEM budget --------------------------------------
    gen = _tpu_generation()
    if gen == "v7x":              # 64 MiB VMEM per TensorCore -> stay modest
        ws_budget, vmem_limit, allow_split = 12 * _MIB, 32 * _MIB, True
    elif gen in ("v6e", "v5e"):   # 128 MiB physical VMEM
        ws_budget, vmem_limit, allow_split = 16 * _MIB, 64 * _MIB, False
    else:                         # unknown generation: conservative
        ws_budget, vmem_limit, allow_split = 12 * _MIB, 32 * _MIB, False

    # Per-lane working set: double-buffered native-dtype logit block, ~5 f32
    # (C, tile) compiler temporaries, and the 8-sublane-padded (1, tile)
    # target + output blocks (32 B/lane each, double buffered).
    dsize = jnp.dtype(output.dtype).itemsize
    per_lane = 2 * C * dsize + 5 * 4 * C + 4 * 32
    hw_ceil = pl.cdiv(HW, 128) * 128
    tile = (ws_budget // per_lane) // 128 * 128
    tile = min(tile, 128 * 1024, hw_ceil)
    if tile_px is not None:
        tile = min(tile, max(128, int(tile_px) // 128 * 128))
    tile = max(128, tile)

    n_tiles = pl.cdiv(HW, tile)
    # Feed v7x's second TensorCore when the batch axis alone cannot.
    n_split = 2 if (allow_split and N == 1 and n_tiles >= 2) else 1
    n_inner = pl.cdiv(n_tiles, n_split)

    if n_split == 1:
        x_idx = lambda n, s, j: (n, 0, j)
        t_idx = lambda n, s, j: (n, 0, j)
    else:
        last = n_tiles - 1
        x_idx = lambda n, s, j: (n, 0, jnp.minimum(s * n_inner + j, last))
        t_idx = lambda n, s, j: (n, 0, jnp.minimum(s * n_inner + j, last))

    kernel = functools.partial(
        _focal_ce_kernel, gamma=float(gamma), alpha=float(alpha),
        num_classes=C, hw=HW, n_tiles=n_tiles, n_inner=n_inner)

    partial_sums = pl.pallas_call(
        kernel,
        out_shape=jax.ShapeDtypeStruct((N * n_split, 1, tile), jnp.float32),
        grid_spec=pltpu.PrefetchScalarGridSpec(
            num_scalar_prefetch=0,
            grid=(N, n_split, n_inner),
            in_specs=[
                pl.BlockSpec((None, C, tile), x_idx),
                pl.BlockSpec((None, 1, tile), t_idx),
            ],
            out_specs=pl.BlockSpec((None, 1, tile),
                                   lambda n, s, j: (n * n_split + s, 0, 0)),
        ),
        compiler_params=pltpu.CompilerParams(
            dimension_semantics=("parallel", "parallel", "arbitrary"),
            vmem_limit_bytes=vmem_limit,
        ),
    )(x, t)

    # Single cross-lane reduce + mean, outside the hot loop.
    return jnp.sum(partial_sums) / jnp.float32(n_valid)


def focal_ce_loss_ref(output, target, *, gamma=2.0, alpha=0.25):
    """Pure-JAX reference mirroring the PyTorch module."""
    logp = jax.nn.log_softmax(output.astype(jnp.float32), axis=1)      # (N,C,H,W)
    p = jnp.exp(logp)
    t = target[:, None, :, :].astype(jnp.int32)                        # (N,1,H,W)
    logpt = jnp.take_along_axis(logp, t, axis=1)
    pt = jnp.take_along_axis(p, t, axis=1)
    loss = alpha * jnp.power(1.0 - pt, gamma) * (-logpt)
    return jnp.mean(loss)


if __name__ == "__main__":
    key = jax.random.PRNGKey(0)
    k1, k2 = jax.random.split(key)

    N, C, H, W = 2, 4, 16, 16
    gamma = 2.0  # configer 'focal_y' — deterministic in-script constant

    output = jax.random.normal(k1, (N, C, H, W), dtype=jnp.float32)
    # byte-sized labels exercise the narrow-target DMA path
    target = jax.random.randint(k2, (N, H, W), 0, C, dtype=jnp.int32).astype(jnp.int8)

    loss = focal_ce_loss(output, target, gamma=gamma)
    loss = jax.block_until_ready(loss)

    ref = focal_ce_loss_ref(output, target, gamma=gamma)
    assert jnp.allclose(loss, ref, rtol=1e-5, atol=1e-6), (loss, ref)

    print("KERNEL_OK")
</pallas_src>

<mosaic_0001>
module attributes {stable_mosaic.version = 11 : i64} {
  func.func @_focal_ce_kernel(%arg0: i32, %arg1: i32, %arg2: i32, %arg3: memref<1x4x256xf32, #tpu.memory_space<vmem>>, %arg4: memref<1x1x256xi8, #tpu.memory_space<vmem>>, %arg5: memref<1x1x256xf32, #tpu.memory_space<vmem>>) attributes {dimension_semantics = [#tpu.dimension_semantics<parallel>, #tpu.dimension_semantics<parallel>, #tpu.dimension_semantics<arbitrary>], iteration_bounds = array<i64: 2, 1, 1>, scalar_prefetch = 0 : i64, scratch_operands = 0 : i64, tpu.core_type = #tpu.core_type<tc>, window_params = [{transform_indices = @transform_0, window_bounds = array<i64: 1, 4, 256>}, {transform_indices = @transform_1, window_bounds = array<i64: 1, 1, 256>}, {transform_indices = @transform_2, window_bounds = array<i64: 1, 1, 256>}]} {
    %c0_i32 = arith.constant 0 : i32
    %0 = arith.cmpi eq, %arg2, %c0_i32 : i32
    %1 = arith.extui %0 : i1 to i32
    %c0_i32_0 = arith.constant 0 : i32
    %2 = arith.cmpi ne, %1, %c0_i32_0 : i32
    scf.if %2 {
      %cst = arith.constant 0.000000e+00 : f32
      %8 = vector.broadcast %cst : f32 to vector<1x256xf32>
      %c0 = arith.constant 0 : index
      %c0_3 = arith.constant 0 : index
      %c0_4 = arith.constant 0 : index
      %9 = vector.load %arg5[%c0, %c0_3, %c0_4] : memref<1x1x256xf32, #tpu.memory_space<vmem>>, vector<1x1x256xf32>
      %10 = vector.shape_cast %9 : vector<1x1x256xf32> to vector<1x256xf32>
      %11 = vector.shape_cast %8 : vector<1x256xf32> to vector<1x1x256xf32>
      tpu.vector_store %arg5[%c0, %c0_3, %c0_4], %11 {strides = array<i32>} : memref<1x1x256xf32, #tpu.memory_space<vmem>>, vector<1x1x256xf32>,
    } else {
    }
    %c1_i32 = arith.constant 1 : i32
    %3 = arith.muli %arg1, %c1_i32 : i32
    %4 = arith.addi %3, %arg2 : i32
    %c1_i32_1 = arith.constant 1 : i32
    %5 = arith.cmpi slt, %4, %c1_i32_1 : i32
    %6 = arith.extui %5 : i1 to i32
    %c0_i32_2 = arith.constant 0 : i32
    %7 = arith.cmpi ne, %6, %c0_i32_2 : i32
    scf.if %7 {
      %c0 = arith.constant 0 : index
      %c0_3 = arith.constant 0 : index
      %c0_4 = arith.constant 0 : index
      %8 = vector.load %arg3[%c0, %c0_3, %c0_4] : memref<1x4x256xf32, #tpu.memory_space<vmem>>, vector<1x4x256xf32>
      %9 = vector.shape_cast %8 : vector<1x4x256xf32> to vector<4x256xf32>
      %c0_5 = arith.constant 0 : index
      %c0_6 = arith.constant 0 : index
      %c0_7 = arith.constant 0 : index
      %10 = vector.load %arg4[%c0_5, %c0_6, %c0_7] : memref<1x1x256xi8, #tpu.memory_space<vmem>>, vector<1x1x256xi8>
      %11 = vector.shape_cast %10 : vector<1x1x256xi8> to vector<1x256xi8>
      %12 = arith.extsi %11 : vector<1x256xi8> to vector<1x256xi32>
      %c1_i32_8 = arith.constant 1 : i32
      %13 = arith.muli %arg1, %c1_i32_8 : i32
      %14 = arith.addi %13, %arg2 : i32
      %c0_i32_9 = arith.constant 0 : i32
      %15 = arith.minsi %14, %c0_i32_9 : i32
      %16 = tpu.iota {dimensions = array<i32: 1>} : vector<1x256xi32>
      %c256_i32 = arith.constant 256 : i32
      %17 = arith.muli %15, %c256_i32 : i32
      %18 = vector.broadcast %17 : i32 to vector<1x256xi32>
      %19 = arith.addi %18, %16 : vector<1x256xi32>
      %c256_i32_10 = arith.constant 256 : i32
      %20 = vector.broadcast %c256_i32_10 : i32 to vector<1x256xi32>
      %21 = arith.cmpi slt, %19, %20 : vector<1x256xi32>
      %c0_i32_11 = arith.constant 0 : i32
      %22 = vector.broadcast %c0_i32_11 : i32 to vector<1x256xi32>
      %23 = arith.cmpi sge, %12, %22 : vector<1x256xi32>
      %24 = arith.andi %21, %23 : vector<1x256xi1>
      %c4_i32 = arith.constant 4 : i32
      %25 = vector.broadcast %c4_i32 : i32 to vector<1x256xi32>
      %26 = arith.cmpi slt, %12, %25 : vector<1x256xi32>
      %27 = arith.andi %24, %26 : vector<1x256xi1>
      %cst = arith.constant dense<0xFF800000> : vector<256xf32>
      %28 = vector.multi_reduction <maximumf>, %9, %cst [0] : vector<4x256xf32> to vector<256xf32>
      %29 = vector.shape_cast %28 : vector<256xf32> to vector<1x256xf32>
      %30 = vector.broadcast %29 : vector<1x256xf32> to vector<4x256xf32>
      %31 = arith.subf %9, %30 : vector<4x256xf32>
      %32 = math.exp %31 : vector<4x256xf32>
      %cst_12 = arith.constant dense<0.000000e+00> : vector<256xf32>
      %33 = vector.multi_reduction <add>, %32, %cst_12 [0] : vector<4x256xf32> to vector<256xf32>
      %34 = vector.shape_cast %33 : vector<256xf32> to vector<1x256xf32>
      %35 = math.log %34 : vector<1x256xf32>
      %36 = tpu.iota {dimensions = array<i32: 0>} : vector<4x256xi32>
      %37 = vector.broadcast %12 : vector<1x256xi32> to vector<4x256xi32>
      %38 = arith.cmpi eq, %36, %37 : vector<4x256xi32>
      %cst_13 = arith.constant 0.000000e+00 : f32
      %39 = vector.broadcast %cst_13 : f32 to vector<4x256xf32>
      %40 = arith.select %38, %31, %39 : vector<4x256xi1>, vector<4x256xf32>
      %cst_14 = arith.constant dense<0.000000e+00> : vector<256xf32>
      %41 = vector.multi_reduction <add>, %40, %cst_14 [0] : vector<4x256xf32> to vector<256xf32>
      %42 = vector.shape_cast %41 : vector<256xf32> to vector<1x256xf32>
      %43 = arith.subf %42, %35 : vector<1x256xf32>
      %44 = math.exp %43 : vector<1x256xf32>
      %cst_15 = arith.constant 1.000000e+00 : f32
      %45 = vector.broadcast %cst_15 : f32 to vector<1x256xf32>
      %46 = arith.subf %45, %44 : vector<1x256xf32>
      %47 = arith.mulf %46, %46 : vector<1x256xf32>
      %cst_16 = arith.constant 2.500000e-01 : f32
      %48 = vector.broadcast %cst_16 : f32 to vector<1x256xf32>
      %49 = arith.mulf %48, %47 : vector<1x256xf32>
      %cst_17 = arith.constant 0.000000e+00 : f32
      %50 = vector.broadcast %cst_17 : f32 to vector<1x256xf32>
      %51 = arith.subf %50, %43 : vector<1x256xf32>
      %52 = arith.mulf %49, %51 : vector<1x256xf32>
      %c0_18 = arith.constant 0 : index
      %c0_19 = arith.constant 0 : index
      %c0_20 = arith.constant 0 : index
      %53 = vector.load %arg5[%c0_18, %c0_19, %c0_20] : memref<1x1x256xf32, #tpu.memory_space<vmem>>, vector<1x1x256xf32>
      %54 = vector.shape_cast %53 : vector<1x1x256xf32> to vector<1x256xf32>
      %cst_21 = arith.constant 0.000000e+00 : f32
      %55 = vector.broadcast %cst_21 : f32 to vector<1x256xf32>
      %56 = arith.select %27, %52, %55 : vector<1x256xi1>, vector<1x256xf32>
      %57 = arith.addf %54, %56 : vector<1x256xf32>
      %c0_22 = arith.constant 0 : index
      %c0_23 = arith.constant 0 : index
      %c0_24 = arith.constant 0 : index
      %58 = vector.load %arg5[%c0_22, %c0_23, %c0_24] : memref<1x1x256xf32, #tpu.memory_space<vmem>>, vector<1x1x256xf32>
      %59 = vector.shape_cast %58 : vector<1x1x256xf32> to vector<1x256xf32>
      %60 = vector.shape_cast %57 : vector<1x256xf32> to vector<1x1x256xf32>
      tpu.vector_store %arg5[%c0_22, %c0_23, %c0_24], %60 {strides = array<i32>} : memref<1x1x256xf32, #tpu.memory_space<vmem>>, vector<1x1x256xf32>,
    } else {
    }
    return
  }
  func.func @transform_0(%arg0: i32, %arg1: i32, %arg2: i32) -> (i32, i32, i32) {
    %c0_i32 = arith.constant 0 : i32
    %c0_i32_0 = arith.constant 0 : i32
    return %arg0, %c0_i32, %arg2 : i32, i32, i32
  }
  func.func @transform_1(%arg0: i32, %arg1: i32, %arg2: i32) -> (i32, i32, i32) {
    %c0_i32 = arith.constant 0 : i32
    %c0_i32_0 = arith.constant 0 : i32
    return %arg0, %c0_i32, %arg2 : i32, i32, i32
  }
  func.func @transform_2(%arg0: i32, %arg1: i32, %arg2: i32) -> (i32, i32, i32) {
    %c1_i32 = arith.constant 1 : i32
    %0 = arith.muli %arg0, %c1_i32 : i32
    %1 = arith.addi %0, %arg1 : i32
    %c0_i32 = arith.constant 0 : i32
    %c0_i32_0 = arith.constant 0 : i32
    %c0_i32_1 = arith.constant 0 : i32
    return %1, %c0_i32, %c0_i32_0 : i32, i32, i32
  }
}

</mosaic_0001>

<bundles_post_ra>
// kernel: tpu_custom_call.1
= control target key start
LH: loop header
LB: loop body
LE: loop exit
PB: predicated region body
PF: predicated region fallthrough
CT: control target
= control target key end

     0   :  { %7 = vsyncpa [#allocation3], 0  ;;  %s983_s0 = inlined_call_operand.hbm [shape: f32[2,4,256], index: 0, kind: input, shape index: {}]   ;;  %s984_s1 = inlined_call_operand.vmem [shape: s8[2,1,256], index: 1, kind: input, shape index: {}]   ;;  %s985_s2 = inlined_call_operand.hbm [shape: f32[2,1,256], index: 2, kind: output, shape index: {}]  }
   0x1   :  { %9 = vsyncpa [#allocation3 + $0x1], 0 }
   0x2   :  { %10 = vsyncpa [#allocation4], 0 }
   0x3   :  { %12 = vsyncpa [#allocation4 + $0x1], 0  ;;  %s748_s9 = smov 0   ;;  %s750_s10 = smov 0  }
   0x4   :  { %s752_s11 = smov 0   ;;  %s754_s12 = smov 0  }
   0x5   :  { %s756_s13 = smov 0   ;;  %s758_s14 = smov 0  }
   0x6 LB: > { %s520_s15 = sadd.s32 4294967295, %s726_s14   ;;  %s521_s16 = sadd.s32 4294967294, %s726_s14   ;;  %s726_s14 = sphi %s758_s14, %s18_s14   ;;  %s722_s13 = sphi %s756_s13, %s1007_s13   ;;  %s718_s12 = sphi %s754_s12, %s1006_s12   ;;  %s714_s11 = sphi %s752_s11, %s1005_s11   ;;  %s710_s10 = sphi %s750_s10, %s1004_s10   ;;  %s706_s9 = sphi %s748_s9, %s1003_s9  }
   0x7   : > { %s37_s17 = sadd.s32 1, %s722_s13  ;;  %s46_s18 = sadd.s32 1, %s714_s11 }
   0x8   : > { %p39_p0 = scmp.ge.s32.totalorder %s37_s17, 2  ;;  %p53_p1 = scmp.ne.s32.totalorder %s714_s11, %s710_s10 }
   0x9   : > { %p54_p2 = scmp.eq.s32.totalorder %s726_s14, 0  ;;  %p59_p3 = scmp.ne.s32.totalorder %s710_s10, %s706_s9 }
   0xa   : > { %s1009_s17 = smov (%p39_p0, %s37_s17), 0  ;;  %p60_p5 = scmp.eq.s32.totalorder %s520_s15, 0 }
   0xb   : > { %p789_p4 = por %p54_p2, %p53_p1  ;;  %s41_s20 = ssub.s32 %s722_s13, %s1009_s17 }
   0xc   : > { %p113_p6 = scmp.eq.s32.totalorder %s520_s15, 1  ;;  %p44_p7 = scmp.eq.s32.totalorder %s41_s20, 0 }
   0xd   : > { %p795_p8 = por %p60_p5, %p59_p3  ;;  %p119_p10 = scmp.eq.s32.totalorder %s521_s16, 1 }
   0xe   : > { %p799_p9 = por %p113_p6, %p53_p1  ;;  %p550_p13 = scmp.lt.s32.totalorder %s726_s14, 2 }
   0xf   : > { %s804_s23 = scalar_select %p44_p7, %s714_s11, %s46_s18  }
  0x10   : > { %s989_s22 = scalar_select %p799_p9, 1, 0 }
  0x11   : > { %p806_p11 = por %p119_p10, %p59_p3  ;;  %s139_s25 = sand.u32 1, %s714_s11  }
  0x12   : > { %s524_s26 = sshll.u32 %s139_s25, 3  ;;  %s536_s27 = sshll.u32 %s722_s13, 7 }
  0x13   : > { %s990_s24 = scalar_select %p806_p11, 1, 0 }
  0x14   : > { %s817_s30 = scalar_lea.hbm %s983_s0, %s536_s27  ;;  %s143_s3 = scalar_lea.vmem [#allocation2], %s524_s26 }
  0x15   : > { %s153_s4 = sshll.u32 %s143_s3, 4  ;;  %p823_p0 = pnand %p550_p13, %p789_p4  ;;  %s819_s4 = int_to_ptr.vmem [resolvable:$true] %s153_s4 }
  0x16   : > { %s140_s6 = scalar_lea.sflag [#allocation3], %s139_s25  ;;  %s614_s7 = scalar_lea.hbm %s817_s30, 128 }
  0x17   : > { %p615_p3 = scmp.ne.s32.totalorder %s817_s30, %s614_s7  ;;  %p616_p5 = pneg %p823_p0 }
  0x18   : > { %s619_s16 = scalar_lea.hbm %s983_s0, 256  ;;  %p620_p4 = scmp.lt.u32.totalorder %s817_s30, %s983_s0 }
  0x19   : > { %p617_p6 = pnand %p616_p5, %p615_p3  ;;  %p621_p10 = scmp.lt.u32.totalorder %s619_s16, %s614_s7 }
  0x1a   : > { %p623_p12 = scmp.lt.u32.totalorder %s614_s7, %s817_s30 }
  0x1b   : > { %p618_p7 = pneg %p617_p6  ;;  %p622_p13 = por %p621_p10, %p620_p4 }
  0x1d   : > { %p624_p1 = por %p623_p12, %p622_p13 }
  0x1f   : > { %p625_p2 = pnand %p624_p1, %p618_p7 }
  0x21   : > { %628 = shalt.err (!%p625_p2)
}
  0x22   : > { %s629_s20 = scalar_lea.vmem %s819_s4, 128  ;;  %s728_s25 = smov [#allocation2]  }
  0x23   : > { %p630_p3 = scmp.ne.s32.totalorder %s819_s4, %s629_s20  ;;  %s634_s26 = sshll.u32 %s728_s25, 4  ;;  %s635_s26 = int_to_ptr.vmem [resolvable:$false] %s634_s26 }
  0x24   : > { %s636_s27 = scalar_lea.vmem %s635_s26, 256  ;;  %p637_p9 = scmp.lt.s32.totalorder %s819_s4, %s635_s26 }
  0x25   : > { %p632_p6 = pnand %p630_p3, %p616_p5  ;;  %p638_p4 = scmp.lt.s32.totalorder %s636_s27, %s629_s20 }
  0x27   : > { %p633_p11 = pneg %p632_p6  ;;  %p639_p10 = por %p638_p4, %p637_p9 }
  0x29   : > { %p640_p12 = pnand %p639_p10, %p633_p11 }
  0x2b   : > { %643 = shalt.err (!%p640_p12)
}
  0x2c   : > { %545 = dma.hbm_to_vmem [thread:$0]  (!%p823_p0), %s817_s30, 128, %s819_s4, %s140_s6  }
  0x2d   : > { %p992_p1 = scmp.lt.s32.totalorder %s726_s14, 3  ;;  %p993_p2 = scmp.ge.s32.totalorder %s726_s14, 1 }
  0x2f   : > { %p171_p5 = pnand %p993_p2, %p992_p1 }
  0x30   : > { %s859_s28 = sand.u32 (!%p171_p5), 1, %s710_s10  }
  0x31   : > { %174 = sbr.rel (%p171_p5) target bundleno = 164 (0xa4), region = 28  ;;  %s528_s29 = sshll.u32 (!%p171_p5), %s859_s28, 3 }
  0x32   : > { %s177_s3 = scalar_lea.sflag (!%p171_p5), [#allocation3], %s859_s28  ;;  %s180_s7 = scalar_lea.vmem (!%p171_p5), [#allocation2], %s528_s29 }
  0x38   : > { %697 = dma.done.wait (%p795_p8), %s177_s3, 128  }
  0x39   : > { %699 = vsyncadd (%p795_p8), %s177_s3, 4294967168  ;;  %s529_s30 = sshll.u32 %s859_s28, 1  ;;  %v224_v0 = vlaneseq  ;;  %v729_v2 = vmov 0.0   ;;  %p211_p9 = scmp.lt.s32.totalorder %s718_s12, 1  ;;  %vm279_vm1 = vcmask 1043456   ;;  %v234_v3 = vld [vmem:[%s180_s7] sm:$0xff] }
  0x3a   : > { %s872_s4 = scalar_lea.vmem [#allocation5], %s529_s30  ;;  %v277_v4 = vcombine.high %v234_v3, %v234_v3  ;;  %v280_v5 = vsel %vm279_vm1, %v234_v3, -inf  ;;  %s537_s16 = sshll.u32 %s718_s12, 5 }
  0x3b   : > { %vm868_vm0 = vcmp.lt.s32.totalorder %v224_v0, 256  ;;  %s212_s21 = scalar_select %p211_p9, %s718_s12, 1  ;;  %v281_v6 = vrot.slane %v280_v5, 4  ;;  %v884_v14 = vshrl.u32 %v224_v0, 7 }
  0x3c   : > { %228 = vst.msk [vmem:[%s872_s4] sm:$0x3] %vm868_vm0, %v729_v2  ;;  %v287_v7 = vsel %vm279_vm1, %v277_v4, -inf  ;;  %s420_s18 = sshll.u32 %s872_s4, 4  ;;  %s931_s25 = scalar_lea.hbm %s985_s2, %s537_s16  ;;  %s933_s18 = int_to_ptr.vmem [resolvable:$true] %s420_s18 }
  0x3d   : > { %v282_v8 = vmax.f32 %v280_v5, %v281_v6  ;;  %v288_v9 = vrot.slane %v287_v7, 4  ;;  %s530_s5 = sshll.u32 %s212_s21, 1  ;;  %v889_v21 = vsub.s32 0, %v884_v14  ;;  %v892_v23 = vsub.s32 4, %v884_v14  ;;  %s405_s26 = scalar_lea.sflag [#allocation4], %s859_s28 }
  0x3e   : > { %s217_s15 = scalar_lea.vmem %s984_s1, %s530_s5  ;;  %s644_s27 = scalar_lea.vmem %s933_s18, 32 }
  0x3f   : > { %v283_v10 = vrot.slane %v282_v8, 2  ;;  %v289_v11 = vmax.f32 %v287_v7, %v288_v9  ;;  %v235_v17 = vld [vmem:[%s217_s15] sm:$0x3]  ;;  %v730_v9 = vmov 0   ;;  %p645_p8 = scmp.ne.s32.totalorder %s933_s18, %s644_s27  ;;  %p1000_p11 = scmp.ne.s32.totalorder %s989_s22, 0 }
  0x40   : > { %v886_v20 = vunpack.c.0.s8 %v235_v17  ;;  %s732_s12 = smov [#allocation5]  }
  0x41   : > { %v284_v12 = vmax.f32 %v282_v8, %v283_v10  ;;  %v290_v13 = vrot.slane %v289_v11, 2  ;;  %p646_p0 = pnand %p645_p8, %p1000_p11  ;;  %s648_s29 = sshll.u32 %s732_s12, 4  ;;  %s649_s29 = int_to_ptr.vmem [resolvable:$false] %s648_s29 }
  0x42   : > { %v327_v26 = vrot.slane %v886_v20, %v889_v21  ;;  %v331_v28 = vrot.slane %v886_v20, %v892_v23  ;;  %vm248_vm4 = vcmp.ge.s32.totalorder %v886_v20, 0  ;;  %vm262_vm5 = vcmp.lt.s32.totalorder %v886_v20, 4  ;;  %s650_s3 = scalar_lea.vmem %s649_s29, 64  ;;  %p651_p13 = scmp.lt.s32.totalorder %s933_s18, %s649_s29 }
  0x43   : > { %v285_v15 = vrot.slane %v284_v12, 1  ;;  %v291_v16 = vmax.f32 %v289_v11, %v290_v13  ;;  %v249_v10 = vsel %vm248_vm4, 1, %v730_v9  ;;  %v263_v11 = vsel %vm262_vm5, 1, %v730_v9  ;;  %p647_p7 = pneg %p646_p0  ;;  %p652_p3 = scmp.lt.s32.totalorder %s650_s3, %s644_s27 }
  0x44   : > { %v335_v29 = vrot.slane %v327_v26, %v889_v21  ;;  %v339_v30 = vrot.slane %v331_v28, %v889_v21  ;;  %v267_v13 = vrot.slane %v263_v11, %v889_v21  ;;  %v271_v17 = vrot.slane %v263_v11, %v892_v23 }
  0x45   : > { %v286_v18 = vmax.f32 %v284_v12, %v285_v15  ;;  %v292_v19 = vrot.slane %v291_v16, 1  ;;  %v253_v12 = vrot.slane %v249_v10, %v889_v21  ;;  %p653_p6 = por %p652_p3, %p651_p13 }
  0x46   : > { %vm340_vm2 = vcmp.eq.s32.totalorder %v884_v14, %v335_v29  ;;  %vm341_vm3 = vcmp.eq.s32.totalorder %v884_v14, %v339_v30  ;;  %vm916_vm7 = vcmp.ne.s32.totalorder %v267_v13, 0  ;;  %vm273_vm9 = vcmp.ne.s32.totalorder %v271_v17, 0 }
  0x47   : > { %v293_v22 = vmax.f32 %v291_v16, %v292_v19  ;;  %v257_v16 = vrot.slane %v249_v10, %v892_v23  ;;  %vm912_vm6 = vcmp.ne.s32.totalorder %v253_v12, 0  ;;  %p654_p4 = pnand %p653_p6, %p647_p7 }
  0x48   : > { %vm274_vm10 = vmand %vm912_vm6, %vm916_vm7 }
  0x49   : > { %v296_v24 = vcombine.low %v286_v18, %v293_v22  ;;  %vm259_vm8 = vcmp.ne.s32.totalorder %v257_v16, 0 }
  0x4a   : > { %vm275_vm11 = vmand %vm259_vm8, %vm273_vm9 }
  0x4b   : > { %v298_v25 = vsub.f32 %v234_v3, %v296_v24  ;;  %v731_v24 = vmov 1966171168  }
  0x4c   : > { %v384_v20 = vunpack.c.l.s4 %v731_v24 }
  0x4d   : > { %v299_v27 = vmul.f32 1.442695, %v298_v25  ;;  %v343_v31 = vcombine.high %v298_v25, %v298_v25  ;;  %v345_v32 = vsel %vm340_vm2, %v298_v25, 0.0 }
  0x4e   : > { %v347_v35 = vsel %vm279_vm1, %v345_v32, 0.0  ;;  %v385_v30 = vunpack.c.0.s8 %v384_v20 }
  0x4f   : > { %604 = vpow2.f32 %v299_v27  ;;  %v346_v33 = vsel %vm341_vm3, %v343_v31, 0.0  ;;  %v348_v41 = vrot.slane %v347_v35, 4 }
  0x50   : > { %v354_v39 = vsel %vm279_vm1, %v346_v33, 0.0 }
  0x51   : > { %v355_v44 = vrot.slane %v354_v39, 4  ;;  %v349_v47 = vadd.f32 %v348_v41, %v347_v35  ;;  %v388_v35 = vsub.s32 %v385_v30, %v884_v14 }
  0x53   : > { %v356_v50 = vadd.f32 %v355_v44, %v354_v39  ;;  %v350_v53 = vrot.slane %v349_v47, 2  ;;  %v377_v39 = vld [vmem:[%s872_s4] sm:$0x3] }
  0x55   : > { %v357_v56 = vrot.slane %v356_v50, 2  ;;  %v351_v58 = vadd.f32 %v350_v53, %v349_v47 }
  0x57   : > { %v358_v59 = vadd.f32 %v357_v56, %v356_v50  ;;  %v352_v60 = vrot.slane %v351_v58, 1 }
  0x59   : > { %v605_v34 = vpop.eup %604  ;;  %v359_v61 = vrot.slane %v358_v59, 1  ;;  %v353_v62 = vadd.f32 %v352_v60, %v351_v58 }
  0x5a   : > { %v302_v36 = vcombine.high %v605_v34, %v605_v34  ;;  %v304_v37 = vsel %vm279_vm1, %v605_v34, 0.0 }
  0x5b   : > { %v305_v38 = vrot.slane %v304_v37, 4  ;;  %v360_v2 = vadd.f32 %v359_v61, %v358_v59 }
  0x5c   : > { %v311_v40 = vsel %vm279_vm1, %v302_v36, 0.0 }
  0x5d   : > { %v306_v42 = vadd.f32 %v305_v38, %v304_v37  ;;  %v312_v43 = vrot.slane %v311_v40, 4 }
  0x5f   : > { %v307_v45 = vrot.slane %v306_v42, 2  ;;  %v313_v46 = vadd.f32 %v312_v43, %v311_v40 }
  0x61   : > { %v308_v48 = vadd.f32 %v307_v45, %v306_v42  ;;  %v314_v49 = vrot.slane %v313_v46, 2 }
  0x63   : > { %v309_v51 = vrot.slane %v308_v48, 1  ;;  %v315_v52 = vadd.f32 %v314_v49, %v313_v46 }
  0x65   : > { %v310_v54 = vadd.f32 %v309_v51, %v308_v48  ;;  %v316_v55 = vrot.slane %v315_v52, 1 }
  0x67   : > { %v317_v57 = vadd.f32 %v316_v55, %v315_v52  ;;  %606 = vlog2.f32 %v310_v54 }
  0x69   : > { %608 = vlog2.f32 %v317_v57 }
  0x71   : > { %v607_v63 = vpop.eup %606 }
  0x72   : > { %v319_v0 = vmul.f32 0.6931472, %v607_v63 }
  0x73   : > { %v609_v3 = vpop.eup %608 }
  0x74   : > { %v321_v4 = vmul.f32 0.6931472, %v609_v3  ;;  %v361_v5 = vsub.f32 %v353_v62, %v319_v0 }
  0x76   : > { %v362_v6 = vsub.f32 %v360_v2, %v321_v4  ;;  %v363_v7 = vmul.f32 1.442695, %v361_v5  ;;  %v373_v21 = vsub.f32 0.0, %v361_v5 }
  0x78   : > { %610 = vpow2.f32 %v363_v7  ;;  %v365_v8 = vmul.f32 1.442695, %v362_v6  ;;  %v374_v29 = vsub.f32 0.0, %v362_v6 }
  0x7a   : > { %612 = vpow2.f32 %v365_v8 }
  0x82   : > { %v611_v15 = vpop.eup %610 }
  0x83   : > { %v367_v18 = vsub.f32 1.0, %v611_v15 }
  0x84   : > { %v613_v19 = vpop.eup %612 }
  0x85   : > { %v368_v26 = vsub.f32 1.0, %v613_v19  ;;  %v369_v27 = vmul.f32 %v367_v18, %v367_v18 }
  0x87   : > { %v370_v23 = vmul.f32 %v368_v26, %v368_v26  ;;  %v371_v28 = vmul.f32 0.25, %v369_v27 }
  0x89   : > { %v372_v31 = vmul.f32 0.25, %v370_v23  ;;  %v375_v32 = vmul.f32 %v373_v21, %v371_v28 }
  0x8b   : > { %v376_v33 = vmul.f32 %v374_v29, %v372_v31  ;;  %v378_v34 = vsel %vm274_vm10, %v375_v32, 0.0 }
  0x8d   : > { %v379_v36 = vsel %vm275_vm11, %v376_v33, 0.0 }
  0x8e   : > { %v382_v37 = vcombine.low %v378_v34, %v379_v36 }
  0x90   : > { %v389_v38 = vrot.slane %v382_v37, %v388_v35 }
  0x92   : > { %v396_v40 = vrot.slane %v389_v38, %v388_v35 }
  0x94   : > { %v398_v41 = vadd.f32 %v396_v40, %v377_v39 }
  0x96   : > { %403 = vst.msk [vmem:[%s872_s4] sm:$0x3] %vm868_vm0, %v398_v41 }
  0x97   : > { %657 = shalt.err (!%p654_p4)
}
  0x98   : > { %s658_s28 = scalar_lea.hbm %s931_s25, 32  ;;  %s662_s4 = scalar_lea.hbm %s985_s2, 64 }
  0x99   : > { %p659_p10 = scmp.ne.s32.totalorder %s931_s25, %s658_s28  ;;  %p663_p2 = scmp.lt.u32.totalorder %s931_s25, %s985_s2 }
  0x9a   : > { %p664_p5 = scmp.lt.u32.totalorder %s662_s4, %s658_s28  ;;  %p666_p8 = scmp.lt.u32.totalorder %s658_s28, %s931_s25 }
  0x9b   : > { %p660_p12 = pnand %p659_p10, %p1000_p11 }
  0x9c   : > { %p665_p9 = por %p664_p5, %p663_p2 }
  0x9d   : > { %p661_p1 = pneg %p660_p12 }
  0x9e   : > { %p667_p0 = por %p666_p8, %p665_p9 }
  0xa0   : > { %p668_p7 = pnand %p667_p0, %p661_p1 }
  0xa2   : > { %671 = shalt.err (!%p668_p7)
}
  0xa3   : > { %540 = dma.vmem_to_hbm [thread:$0]  (%p1000_p11), %s933_s18, 32, %s931_s25, %s405_s26  }
  0xa4 PF: > { %s432_s6 = sand.u32 1, %s706_s9   ;;  %p1001_p13 = scmp.ne.s32.totalorder %s990_s24, 0 }
  0xa5   : > { %p1002_p3 = scmp.ge.s32.totalorder %s726_s14, 2  ;;  %s433_s8 = scalar_lea.sflag [#allocation4], %s432_s6 }
  0xa7   : > { %p547_p6 = pnand %p1002_p3, %p1001_p13 }
  0xa9   : > { %701 = dma.done.wait (!%p547_p6), %s433_s8, 32  }
  0xaa   : > { %703 = vsyncadd (!%p547_p6), %s433_s8, 4294967264  ;;  %s18_s14 = sadd.s32 1, %s726_s14   ;;  %s1003_s9 = smov %s710_s10 }
  0xab   : > { %p15_p4 = scmp.ge.s32.totalorder %s18_s14, 4   ;;  %s1004_s10 = smov %s714_s11 }
  0xac   : > { %s1005_s11 = smov %s804_s23  ;;  %s1006_s12 = smov %s722_s13 }
  0xad   : > { %s1007_s13 = smov %s1009_s17  ;;  %17 = sbr.rel (!%p15_p4) target bundleno = 6 (0x6), region = 84 }
  0xb4   :  { %438 = vsyncpa [#allocation3], 1 }
  0xb5   :  { %440 = vsyncpa [#allocation3 + $0x1], 1 }
  0xb6   :  { %441 = vsyncpa [#allocation4], 1 }
  0xb7   :  { %443 = vsyncpa [#allocation4 + $0x1], 1 }

</bundles_post_ra>
